<compile_context>
chip_gen: v7x
topology: tpu7x:2x2x1
jax: 0.10.0
libtpu: 0.0.40
codegen_flags: <defaults>
</compile_context>

<pallas_src>
from functools import partial

import jax
import jax.numpy as jnp
from jax.experimental import pallas as pl
from jax.experimental.pallas import tpu as pltpu


def _gatnet_fused_kernel(x_ref, w1_ref, a1_ref, w2_ref, a2_ref, bias_ref, out_ref,
                         *, mm_dtype):
    """Fused GATConv -> (eval dropout) -> GATConv. Single grid point, all in VMEM."""
    bias = bias_ref[...]                                   # (Np, Np) additive mask

    def cast(t):
        return t.astype(mm_dtype)

    def gat_layer(feat, w_ref, a_ref):
        # Feature transform on the MXU (f32 accumulation).
        h = jnp.dot(cast(feat), cast(w_ref[...]),
                    preferred_element_type=jnp.float32)    # (Np, Dp)

        # Per-node attention scalars via one lane-dense MXU matmul:
        #   column 0 of A = att_dst, column 1 = att_src, rest zero.
        s = jnp.dot(h, a_ref[...],
                    preferred_element_type=jnp.float32)    # (Np, 128)
        s_dst = s[:, 0:1]                                  # (Np, 1)  target term
        s_src = s[:, 1]                                    # (Np,)    source term

        # e[i, j] = s_dst[i] + s_src[j], LeakyReLU(0.2), then additive adjacency bias
        # (0 or log(multiplicity) on edges, -1e30 on non-edges -> exp underflows to 0).
        e = s_dst + s_src[None, :]                         # (Np, Np)
        e = jnp.where(e > 0, e, 0.2 * e)                   # LeakyReLU(0.2)
        e = e + bias

        m = jnp.max(e, axis=-1, keepdims=True)
        p = jnp.exp(e - m)                                 # masked entries -> exactly 0
        denom = jnp.sum(p, axis=-1, keepdims=True)         # >= exp(0) term from self-loop
        alpha = p * pl.reciprocal(denom, approx=True)      # EUP vrcp (free slot)

        # Neighborhood aggregation on the MXU.
        return jnp.dot(cast(alpha), cast(h),
                       preferred_element_type=jnp.float32)  # (Np, Dp)

    h1 = gat_layer(x_ref[...], w1_ref, a1_ref)
    # F.dropout(p=0.2, training=False) and GATConv attention dropout: identity in eval.
    out_ref[...] = gat_layer(h1, w2_ref, a2_ref)


def _round_up(v, m):
    return ((v + m - 1) // m) * m


def _pad_to(x, rows, cols):
    r, c = x.shape
    return jnp.pad(x, ((0, rows - r), (0, cols - c)))


def _stack_att(att_dst, att_src, d_pad):
    """Pack att vectors into a lane-dense (d_pad, 128) matrix: col0=dst, col1=src."""
    a = jnp.zeros((d_pad, 128), jnp.float32)
    a = a.at[: att_dst.shape[1], 0].set(att_dst[0])
    a = a.at[: att_src.shape[1], 1].set(att_src[0])
    return a


def gat_net_forward(x, edges, params, *, use_bf16=False):
    """GatNet.forward as a single fused Pallas kernel call.

    x: (N, d_inp) f32 node features.
    edges: (2, E) int, PyG convention (row 0 = source, row 1 = target).
    use_bf16: cast matmul inputs to bf16 (f32 accumulation) for v6e/v7x MXU throughput.
    """
    n, d_in = x.shape
    d_hid = params["w1"].shape[1]
    d_out = params["w2"].shape[1]

    n_pad = _round_up(n, 8)            # sublane alignment
    d_in_p = _round_up(d_in, 128)      # lane-dense
    d_hid_p = _round_up(d_hid, 128)
    d_out_p = _round_up(d_out, 128)

    # Dense edge-multiplicity matrix C[target, source]. PyG GATConv removes existing
    # self-loops and adds exactly one per node, so the diagonal is forced to 1
    # (padded nodes also get a self-loop purely for numerical safety; sliced away).
    src, dst = edges[0], edges[1]
    counts = jnp.zeros((n_pad, n_pad), jnp.float32).at[dst, src].add(1.0)
    eye = jnp.eye(n_pad, dtype=jnp.float32)
    counts = counts * (1.0 - eye) + eye
    # Additive softmax bias: log(multiplicity) on edges (duplicate edges counted exactly
    # as PyG's per-edge softmax does), -1e30 on non-edges.
    bias = jnp.where(counts > 0.0,
                     jnp.log(jnp.maximum(counts, 1.0)),
                     jnp.float32(-1e30))

    x_p = _pad_to(x, n_pad, d_in_p)
    w1_p = _pad_to(params["w1"], d_in_p, d_hid_p)
    w2_p = _pad_to(params["w2"], d_hid_p, d_out_p)
    a1 = _stack_att(params["adst1"], params["asrc1"], d_hid_p)
    a2 = _stack_att(params["adst2"], params["asrc2"], d_out_p)

    kernel = partial(_gatnet_fused_kernel,
                     mm_dtype=jnp.bfloat16 if use_bf16 else jnp.float32)

    out_p = pl.pallas_call(
        kernel,
        out_shape=jax.ShapeDtypeStruct((n_pad, d_out_p), jnp.float32),
        in_specs=[pl.BlockSpec(memory_space=pltpu.MemorySpace.VMEM)] * 6,
        out_specs=pl.BlockSpec(memory_space=pltpu.MemorySpace.VMEM),
    )(x_p, w1_p, a1, w2_p, a2, bias)

    return out_p[:n, :d_out]


def init_params(key, d_inp, d_outp):
    k = jax.random.split(key, 6)
    glorot = lambda kk, shape: (
        jax.random.uniform(kk, shape, jnp.float32, -1.0, 1.0)
        * jnp.sqrt(6.0 / (shape[0] + shape[1]))
    )
    return {
        # conv1: GATConv(d_inp, d_inp, bias=False), heads=1
        "w1": glorot(k[0], (d_inp, d_inp)),
        "asrc1": glorot(k[1], (1, d_inp)),
        "adst1": glorot(k[2], (1, d_inp)),
        # conv2: GATConv(d_inp, d_outp, bias=False), heads=1
        "w2": glorot(k[3], (d_inp, d_outp)),
        "asrc2": glorot(k[4], (1, d_outp)),
        "adst2": glorot(k[5], (1, d_outp)),
    }


if __name__ == "__main__":
    key = jax.random.PRNGKey(0)
    N, D_INP, D_OUTP, E = 16, 32, 16, 24

    k_x, k_e, k_p = jax.random.split(key, 3)
    x = jax.random.normal(k_x, (N, D_INP), jnp.float32)
    # (2, E) edge_index: row 0 = source, row 1 = target (PyG convention).
    edges = jax.random.randint(k_e, (2, E), 0, N, jnp.int32)
    params = init_params(k_p, D_INP, D_OUTP)

    fwd = jax.jit(partial(gat_net_forward, use_bf16=False))
    out = fwd(x, edges, params)
    out = jax.block_until_ready(out)

    assert out.shape == (N, D_OUTP) and out.dtype == jnp.float32
    assert bool(jnp.all(jnp.isfinite(out)))
    print("KERNEL_OK")
</pallas_src>

<mosaic_0001>
module attributes {stable_mosaic.version = 11 : i64} {
  func.func @_gatnet_fused_kernel(%arg0: memref<16x128xf32, #tpu.memory_space<vmem>>, %arg1: memref<128x128xf32, #tpu.memory_space<vmem>>, %arg2: memref<128x128xf32, #tpu.memory_space<vmem>>, %arg3: memref<128x128xf32, #tpu.memory_space<vmem>>, %arg4: memref<128x128xf32, #tpu.memory_space<vmem>>, %arg5: memref<16x16xf32, #tpu.memory_space<vmem>>, %arg6: memref<16x128xf32, #tpu.memory_space<vmem>>) attributes {dimension_semantics = [], scalar_prefetch = 0 : i64, scratch_operands = 0 : i64, tpu.core_type = #tpu.core_type<tc>} {
    %c0 = arith.constant 0 : index
    %c0_0 = arith.constant 0 : index
    %0 = vector.load %arg5[%c0, %c0_0] : memref<16x16xf32, #tpu.memory_space<vmem>>, vector<16x16xf32>
    %c0_1 = arith.constant 0 : index
    %c0_2 = arith.constant 0 : index
    %1 = vector.load %arg0[%c0_1, %c0_2] : memref<16x128xf32, #tpu.memory_space<vmem>>, vector<16x128xf32>
    %c0_3 = arith.constant 0 : index
    %c0_4 = arith.constant 0 : index
    %2 = vector.load %arg1[%c0_3, %c0_4] : memref<128x128xf32, #tpu.memory_space<vmem>>, vector<128x128xf32>
    %cst = arith.constant dense<0.000000e+00> : vector<16x128xf32>
    %3 = tpu.matmul %1, %2, %cst {dimension_numbers = #tpu.dot_dimension_numbers<[1], [0], [0], [1], [0, 0, 1, 1], [], []>} : vector<16x128xf32>, vector<128x128xf32>, vector<16x128xf32> -> vector<16x128xf32>
    %c0_5 = arith.constant 0 : index
    %c0_6 = arith.constant 0 : index
    %4 = vector.load %arg2[%c0_5, %c0_6] : memref<128x128xf32, #tpu.memory_space<vmem>>, vector<128x128xf32>
    %cst_7 = arith.constant dense<0.000000e+00> : vector<16x128xf32>
    %5 = tpu.matmul %3, %4, %cst_7 {dimension_numbers = #tpu.dot_dimension_numbers<[1], [0], [0], [1], [0, 0, 1, 1], [], []>} : vector<16x128xf32>, vector<128x128xf32>, vector<16x128xf32> -> vector<16x128xf32>
    %6 = vector.extract_strided_slice %5 {offsets = [0, 0], sizes = [16, 1], strides = [1, 1]} : vector<16x128xf32> to vector<16x1xf32>
    %7 = vector.extract_strided_slice %5 {offsets = [0, 1], sizes = [16, 1], strides = [1, 1]} : vector<16x128xf32> to vector<16x1xf32>
    %8 = vector.shape_cast %7 : vector<16x1xf32> to vector<16xf32>
    %9 = vector.shape_cast %8 : vector<16xf32> to vector<1x16xf32>
    %10 = vector.broadcast %6 : vector<16x1xf32> to vector<16x16xf32>
    %11 = vector.broadcast %9 : vector<1x16xf32> to vector<16x16xf32>
    %12 = arith.addf %10, %11 : vector<16x16xf32>
    %cst_8 = arith.constant 0.000000e+00 : f32
    %13 = vector.broadcast %cst_8 : f32 to vector<16x16xf32>
    %14 = arith.cmpf ogt, %12, %13 : vector<16x16xf32>
    %cst_9 = arith.constant 2.000000e-01 : f32
    %15 = vector.broadcast %cst_9 : f32 to vector<16x16xf32>
    %16 = arith.mulf %15, %12 : vector<16x16xf32>
    %17 = arith.select %14, %12, %16 : vector<16x16xi1>, vector<16x16xf32>
    %18 = arith.addf %17, %0 : vector<16x16xf32>
    %cst_10 = arith.constant dense<0xFF800000> : vector<16xf32>
    %19 = vector.multi_reduction <maximumf>, %18, %cst_10 [1] : vector<16x16xf32> to vector<16xf32>
    %20 = vector.shape_cast %19 : vector<16xf32> to vector<16x1xf32>
    %21 = vector.broadcast %20 : vector<16x1xf32> to vector<16x16xf32>
    %22 = arith.subf %18, %21 : vector<16x16xf32>
    %23 = math.exp %22 : vector<16x16xf32>
    %cst_11 = arith.constant dense<0.000000e+00> : vector<16xf32>
    %24 = vector.multi_reduction <add>, %23, %cst_11 [1] : vector<16x16xf32> to vector<16xf32>
    %25 = vector.shape_cast %24 : vector<16xf32> to vector<16x1xf32>
    %26 = tpu.reciprocal %25 {approx = true} : vector<16x1xf32> -> vector<16x1xf32>
    %27 = vector.broadcast %26 : vector<16x1xf32> to vector<16x16xf32>
    %28 = arith.mulf %23, %27 : vector<16x16xf32>
    %cst_12 = arith.constant dense<0.000000e+00> : vector<16x128xf32>
    %29 = tpu.matmul %28, %3, %cst_12 {dimension_numbers = #tpu.dot_dimension_numbers<[1], [0], [0], [1], [0, 0, 1, 1], [], []>} : vector<16x16xf32>, vector<16x128xf32>, vector<16x128xf32> -> vector<16x128xf32>
    %c0_13 = arith.constant 0 : index
    %c0_14 = arith.constant 0 : index
    %30 = vector.load %arg3[%c0_13, %c0_14] : memref<128x128xf32, #tpu.memory_space<vmem>>, vector<128x128xf32>
    %cst_15 = arith.constant dense<0.000000e+00> : vector<16x128xf32>
    %31 = tpu.matmul %29, %30, %cst_15 {dimension_numbers = #tpu.dot_dimension_numbers<[1], [0], [0], [1], [0, 0, 1, 1], [], []>} : vector<16x128xf32>, vector<128x128xf32>, vector<16x128xf32> -> vector<16x128xf32>
    %c0_16 = arith.constant 0 : index
    %c0_17 = arith.constant 0 : index
    %32 = vector.load %arg4[%c0_16, %c0_17] : memref<128x128xf32, #tpu.memory_space<vmem>>, vector<128x128xf32>
    %cst_18 = arith.constant dense<0.000000e+00> : vector<16x128xf32>
    %33 = tpu.matmul %31, %32, %cst_18 {dimension_numbers = #tpu.dot_dimension_numbers<[1], [0], [0], [1], [0, 0, 1, 1], [], []>} : vector<16x128xf32>, vector<128x128xf32>, vector<16x128xf32> -> vector<16x128xf32>
    %34 = vector.extract_strided_slice %33 {offsets = [0, 0], sizes = [16, 1], strides = [1, 1]} : vector<16x128xf32> to vector<16x1xf32>
    %35 = vector.extract_strided_slice %33 {offsets = [0, 1], sizes = [16, 1], strides = [1, 1]} : vector<16x128xf32> to vector<16x1xf32>
    %36 = vector.shape_cast %35 : vector<16x1xf32> to vector<16xf32>
    %37 = vector.shape_cast %36 : vector<16xf32> to vector<1x16xf32>
    %38 = vector.broadcast %34 : vector<16x1xf32> to vector<16x16xf32>
    %39 = vector.broadcast %37 : vector<1x16xf32> to vector<16x16xf32>
    %40 = arith.addf %38, %39 : vector<16x16xf32>
    %cst_19 = arith.constant 0.000000e+00 : f32
    %41 = vector.broadcast %cst_19 : f32 to vector<16x16xf32>
    %42 = arith.cmpf ogt, %40, %41 : vector<16x16xf32>
    %cst_20 = arith.constant 2.000000e-01 : f32
    %43 = vector.broadcast %cst_20 : f32 to vector<16x16xf32>
    %44 = arith.mulf %43, %40 : vector<16x16xf32>
    %45 = arith.select %42, %40, %44 : vector<16x16xi1>, vector<16x16xf32>
    %46 = arith.addf %45, %0 : vector<16x16xf32>
    %cst_21 = arith.constant dense<0xFF800000> : vector<16xf32>
    %47 = vector.multi_reduction <maximumf>, %46, %cst_21 [1] : vector<16x16xf32> to vector<16xf32>
    %48 = vector.shape_cast %47 : vector<16xf32> to vector<16x1xf32>
    %49 = vector.broadcast %48 : vector<16x1xf32> to vector<16x16xf32>
    %50 = arith.subf %46, %49 : vector<16x16xf32>
    %51 = math.exp %50 : vector<16x16xf32>
    %cst_22 = arith.constant dense<0.000000e+00> : vector<16xf32>
    %52 = vector.multi_reduction <add>, %51, %cst_22 [1] : vector<16x16xf32> to vector<16xf32>
    %53 = vector.shape_cast %52 : vector<16xf32> to vector<16x1xf32>
    %54 = tpu.reciprocal %53 {approx = true} : vector<16x1xf32> -> vector<16x1xf32>
    %55 = vector.broadcast %54 : vector<16x1xf32> to vector<16x16xf32>
    %56 = arith.mulf %51, %55 : vector<16x16xf32>
    %cst_23 = arith.constant dense<0.000000e+00> : vector<16x128xf32>
    %57 = tpu.matmul %56, %31, %cst_23 {dimension_numbers = #tpu.dot_dimension_numbers<[1], [0], [0], [1], [0, 0, 1, 1], [], []>} : vector<16x16xf32>, vector<16x128xf32>, vector<16x128xf32> -> vector<16x128xf32>
    %c0_24 = arith.constant 0 : index
    %c0_25 = arith.constant 0 : index
    %58 = vector.load %arg6[%c0_24, %c0_25] : memref<16x128xf32, #tpu.memory_space<vmem>>, vector<16x128xf32>
    tpu.vector_store %arg6[%c0_24, %c0_25], %57 {strides = array<i32>} : memref<16x128xf32, #tpu.memory_space<vmem>>, vector<16x128xf32>,
    return
  }
}

</mosaic_0001>

<bundles_post_ra>
// kernel: gat_net_forward.1
= control target key start
LH: loop header
LB: loop body
LE: loop exit
PB: predicated region body
PF: predicated region fallthrough
CT: control target
= control target key end

     0   :  { %s1422_s0 = inlined_call_operand.vmem [shape: f32[16,128], index: 0, kind: input, shape index: {}]   ;;  %s1423_s1 = inlined_call_operand.vmem [shape: f32[128,128], index: 1, kind: input, shape index: {}]   ;;  %s1424_s2 = inlined_call_operand.vmem [shape: f32[128,128], index: 2, kind: input, shape index: {}]   ;;  %s1425_s3 = inlined_call_operand.vmem [shape: f32[128,128], index: 3, kind: input, shape index: {}]   ;;  %s1426_s4 = inlined_call_operand.vmem [shape: f32[128,128], index: 4, kind: input, shape index: {}]   ;;  %s1427_s5 = inlined_call_operand.vmem [shape: f32[16,16], index: 5, kind: input, shape index: {}]   ;;  %s1428_s6 = inlined_call_operand.hbm [shape: f32[16,128], index: 6, kind: output, shape index: {}]  }
   0x1   :  { %v28_v0 = vld [vmem:[%s1423_s1] sm:$0xff]  ;;  %v29_v1 = vld [vmem:[%s1423_s1 + $0x8] sm:$0xff]  ;;  %v30_v2 = vld [vmem:[%s1423_s1 + $0x10] sm:$0xff] }
   0x2   :  { %v949_v3 = vpack.c.bf16 %v29_v1, %v28_v0  ;;  %v31_v4 = vld [vmem:[%s1423_s1 + $0x18] sm:$0xff]  ;;  %v32_v6 = vld [vmem:[%s1423_s1 + $0x20] sm:$0xff]  ;;  %v33_v7 = vld [vmem:[%s1423_s1 + $0x28] sm:$0xff] }
   0x3   :  { %v953_v5 = vpack.c.bf16 %v31_v4, %v30_v2  ;;  %v957_v8 = vpack.c.bf16 %v33_v7, %v32_v6  ;;  %v34_v9 = vld [vmem:[%s1423_s1 + $0x30] sm:$0xff]  ;;  %v35_v10 = vld [vmem:[%s1423_s1 + $0x38] sm:$0xff]  ;;  %v26_v11 = vld [vmem:[%s1422_s0] sm:$0xff] }
   0x4   :  { %950 = vmatprep.subr.bf16.mxu0 %v949_v3  ;;  %827 = vmatprep.mubr.f32.mxu0 %v26_v11  ;;  %v119_v12 = vld [vmem:[%s1424_s2] sm:$0xff]  ;;  %v120_v13 = vld [vmem:[%s1424_s2 + $0x8] sm:$0xff]  ;;  %v121_v14 = vld [vmem:[%s1424_s2 + $0x10] sm:$0xff]  ;;  %v961_v20 = vpack.c.bf16 %v35_v10, %v34_v9 }
   0x5   :  { %952 = vmatpush3.bf16.msra.mxu0 %v949_v3  ;;  %v981_v15 = vpack.c.bf16 %v120_v13, %v119_v12  ;;  %v122_v16 = vld [vmem:[%s1424_s2 + $0x18] sm:$0xff]  ;;  %v123_v18 = vld [vmem:[%s1424_s2 + $0x20] sm:$0xff]  ;;  %v124_v19 = vld [vmem:[%s1424_s2 + $0x28] sm:$0xff] }
   0x6   :  { %954 = vmatprep.subr.bf16.mxu0 %v953_v5  ;;  %v985_v17 = vpack.c.bf16 %v122_v16, %v121_v14  ;;  %v36_v21 = vld [vmem:[%s1423_s1 + $0x40] sm:$0xff]  ;;  %v37_v22 = vld [vmem:[%s1423_s1 + $0x48] sm:$0xff]  ;;  %v989_v23 = vpack.c.bf16 %v124_v19, %v123_v18 }
   0x7   :  { %982 = vmatprep.subr.bf16.mxu1 %v981_v15 }
   0x8   :  { %984 = vmatpush3.bf16.msra.mxu1 %v981_v15 }
   0x9   :  { %956 = vmatpush3.bf16.msra.mxu0 %v953_v5  ;;  %986 = vmatprep.subr.bf16.mxu1 %v985_v17 }
   0xa   :  { %958 = vmatprep.subr.bf16.mxu0 %v957_v8 }
   0xb   :  { %11 = vsyncpa [#allocation3], 0  ;;  %v125_v24 = vld [vmem:[%s1424_s2 + $0x30] sm:$0xff]  ;;  %v126_v25 = vld [vmem:[%s1424_s2 + $0x38] sm:$0xff]  ;;  %v965_v26 = vpack.c.bf16 %v37_v22, %v36_v21  ;;  %v1134_v53 = vmov 1   ;;  %v1135_v54 = vmov 0   ;;  %v226_v57 = vlaneseq }
   0xc   :  { %v38_v27 = vld [vmem:[%s1423_s1 + $0x50] sm:$0xff]  ;;  %v39_v28 = vld [vmem:[%s1423_s1 + $0x58] sm:$0xff]  ;;  %988 = vmatpush3.bf16.msra.mxu1 %v985_v17  ;;  %v993_v29 = vpack.c.bf16 %v126_v25, %v125_v24  ;;  %v127_v30 = vld [vmem:[%s1424_s2 + $0x40] sm:$0xff]  ;;  %1090 = vset.pattern.permute.xlu0 %v1134_v53  ;;  %vm237_vm0 = vcmask 130112   ;;  %vm262_vm3 = vcmask 130048  }
   0xd   :  { %960 = vmatpush3.bf16.msra.mxu0 %v957_v8  ;;  %990 = vmatprep.subr.bf16.mxu1 %v989_v23  ;;  %v128_v31 = vld [vmem:[%s1424_s2 + $0x48] sm:$0xff]  ;;  %v969_v32 = vpack.c.bf16 %v39_v28, %v38_v27  ;;  %v40_v33 = vld [vmem:[%s1423_s1 + $0x60] sm:$0xff]  ;;  %v129_v36 = vld [vmem:[%s1424_s2 + $0x50] sm:$0xff]  ;;  %v227_v58 = vand.u32 127, %v226_v57  ;;  %v229_v59 = vshrl.u32 %v226_v57, 7 }
   0xe   :  { %962 = vmatprep.subr.bf16.mxu0 %v961_v20  ;;  %v41_v34 = vld [vmem:[%s1423_s1 + $0x68] sm:$0xff]  ;;  %v997_v35 = vpack.c.bf16 %v128_v31, %v127_v30  ;;  %v130_v37 = vld [vmem:[%s1424_s2 + $0x58] sm:$0xff]  ;;  %v42_v39 = vld [vmem:[%s1423_s1 + $0x70] sm:$0xff]  ;;  %1091 = vset.pattern.permute.xlu1 %v1135_v54 }
   0xf   :  { %v973_v38 = vpack.c.bf16 %v41_v34, %v40_v33  ;;  %v43_v40 = vld [vmem:[%s1423_s1 + $0x78] sm:$0xff]  ;;  %v1001_v41 = vpack.c.bf16 %v130_v37, %v129_v36  ;;  %v131_v42 = vld [vmem:[%s1424_s2 + $0x60] sm:$0xff]  ;;  %v132_v43 = vld [vmem:[%s1424_s2 + $0x68] sm:$0xff]  ;;  %v232_v60 = vadd.s32 4294967288, %v227_v58  ;;  %v1277_v63 = vsub.s32 %v227_v58, %v229_v59 }
  0x10   :  { %992 = vmatpush3.bf16.msra.mxu1 %v989_v23  ;;  %v977_v44 = vpack.c.bf16 %v43_v40, %v42_v39  ;;  %v1005_v45 = vpack.c.bf16 %v132_v43, %v131_v42  ;;  %v133_v46 = vld [vmem:[%s1424_s2 + $0x70] sm:$0xff]  ;;  %v134_v47 = vld [vmem:[%s1424_s2 + $0x78] sm:$0xff]  ;;  %v27_v49 = vld [vmem:[%s1422_s0 + $0x8] sm:$0xff] }
  0x11   :  { %964 = vmatpush3.bf16.msra.mxu0 %v961_v20  ;;  %994 = vmatprep.subr.bf16.mxu1 %v993_v29  ;;  %v1009_v48 = vpack.c.bf16 %v134_v47, %v133_v46  ;;  %v1279_v0 = vsub.s32 %v232_v60, %v229_v59  ;;  %v1287_v8 = vld [vmem:[%s1427_s5 + $0x8] sm:$0xff]  ;;  %v1292_v9 = vld [vmem:[%s1427_s5] sm:$0xff]  ;;  %v368_v30 = vld [vmem:[%s1425_s3 + $0x10] sm:$0xff] }
  0x12   :  { %966 = vmatprep.subr.bf16.mxu0 %v965_v26  ;;  %v366_v28 = vld [vmem:[%s1425_s3] sm:$0xff]  ;;  %v372_v37 = vld [vmem:[%s1425_s3 + $0x30] sm:$0xff]  ;;  %v379_v47 = vld [vmem:[%s1425_s3 + $0x68] sm:$0xff] }
  0x13   :  { %v370_v34 = vld [vmem:[%s1425_s3 + $0x20] sm:$0xff]  ;;  %v376_v43 = vld [vmem:[%s1425_s3 + $0x50] sm:$0xff]  ;;  %v458_v60 = vld [vmem:[%s1426_s4 + $0x8] sm:$0xff] }
  0x14   :  { %996 = vmatpush3.bf16.msra.mxu1 %v993_v29  ;;  %v367_v29 = vld [vmem:[%s1425_s3 + $0x8] sm:$0xff]  ;;  %v374_v40 = vld [vmem:[%s1425_s3 + $0x40] sm:$0xff] }
  0x15   :  { %968 = vmatpush3.bf16.msra.mxu0 %v965_v26  ;;  %998 = vmatprep.subr.bf16.mxu1 %v997_v35  ;;  %v1017_v31 = vpack.c.bf16 %v367_v29, %v366_v28  ;;  %v378_v46 = vld [vmem:[%s1425_s3 + $0x60] sm:$0xff] }
  0x16   :  { %970 = vmatprep.subr.bf16.mxu0 %v969_v32  ;;  %v457_v59 = vld [vmem:[%s1426_s4] sm:$0xff] }
  0x18   :  { %1000 = vmatpush3.bf16.msra.mxu1 %v997_v35  ;;  %v371_v35 = vld [vmem:[%s1425_s3 + $0x28] sm:$0xff] }
  0x19   :  { %972 = vmatpush3.bf16.msra.mxu0 %v969_v32  ;;  %1002 = vmatprep.subr.bf16.mxu1 %v1001_v41  ;;  %v369_v32 = vld [vmem:[%s1425_s3 + $0x18] sm:$0xff]  ;;  %v1025_v36 = vpack.c.bf16 %v371_v35, %v370_v34 }
  0x1a   :  { %974 = vmatprep.subr.bf16.mxu0 %v973_v38  ;;  %v1021_v33 = vpack.c.bf16 %v369_v32, %v368_v30 }
  0x1c   :  { %1004 = vmatpush3.bf16.msra.mxu1 %v1001_v41  ;;  %v375_v41 = vld [vmem:[%s1425_s3 + $0x48] sm:$0xff] }
  0x1d   :  { %976 = vmatpush3.bf16.msra.mxu0 %v973_v38  ;;  %1006 = vmatprep.subr.bf16.mxu1 %v1005_v45  ;;  %v373_v38 = vld [vmem:[%s1425_s3 + $0x38] sm:$0xff]  ;;  %v1033_v42 = vpack.c.bf16 %v375_v41, %v374_v40 }
  0x1e   :  { %978 = vmatprep.subr.bf16.mxu0 %v977_v44  ;;  %v1029_v39 = vpack.c.bf16 %v373_v38, %v372_v37 }
  0x20   :  { %1008 = vmatpush3.bf16.msra.mxu1 %v1005_v45 }
  0x21   :  { %980 = vmatpush3.bf16.msra.mxu0 %v977_v44  ;;  %1010 = vmatprep.subr.bf16.mxu1 %v1009_v48  ;;  %v377_v44 = vld [vmem:[%s1425_s3 + $0x58] sm:$0xff] }
  0x22   :  { %v1037_v45 = vpack.c.bf16 %v377_v44, %v376_v43 }
  0x24   :  { %828 = vmatmul.mubr.f32.vlgmr.msra.gmra.mrb[0].mxu0 %v27_v49  ;;  %1012 = vmatpush3.bf16.msra.mxu1 %v1009_v48  ;;  %v1041_v48 = vpack.c.bf16 %v379_v47, %v378_v46  ;;  %v380_v49 = vld [vmem:[%s1425_s3 + $0x70] sm:$0xff] }
  0x25   :  { %1018 = vmatprep.subr.bf16.mxu1 %v1017_v31 }
  0xf7   :  { %v829_v50 = vpop.f32.mrb[0].mxu0 }
  0xf8   :  { %v110_v51 = vpop.f32.mrb[1].mxu0 }
  0xf9   :  { %v1013_v52 = vpack.c.bf16 %v829_v50, %v110_v51  ;;  %862 = vmatprep.mubr.f32.mxu1 %v110_v51 }
  0xfa   :  { %863 = vmatmul.mubr.f32.vlgmr.msra.gmra.mrb[0].mxu1 %v829_v50  ;;  %v381_v50 = vld [vmem:[%s1425_s3 + $0x78] sm:$0xff] }
  0xfb   :  { %1014 = vmatprep.subr.bf16.mxu0 %v1013_v52  ;;  %1020 = vmatpush3.bf16.msra.mxu1 %v1017_v31  ;;  %v1045_v51 = vpack.c.bf16 %v381_v50, %v380_v49 }
  0xfc   :  { %1016 = vmatpush3.bf16.msra.mxu0 %v1013_v52  ;;  %1022 = vmatprep.subr.bf16.mxu1 %v1021_v33 }
  0xff   :  { %1024 = vmatpush3.bf16.msra.mxu1 %v1021_v33 }
 0x100   :  { %1026 = vmatprep.subr.bf16.mxu1 %v1025_v36 }
 0x103   :  { %1028 = vmatpush3.bf16.msra.mxu1 %v1025_v36 }
 0x104   :  { %1030 = vmatprep.subr.bf16.mxu1 %v1029_v39 }
 0x107   :  { %1032 = vmatpush3.bf16.msra.mxu1 %v1029_v39 }
 0x108   :  { %1034 = vmatprep.subr.bf16.mxu1 %v1033_v42 }
 0x10b   :  { %1036 = vmatpush3.bf16.msra.mxu1 %v1033_v42 }
 0x10c   :  { %1038 = vmatprep.subr.bf16.mxu1 %v1037_v45 }
 0x10f   :  { %1040 = vmatpush3.bf16.msra.mxu1 %v1037_v45 }
 0x110   :  { %1042 = vmatprep.subr.bf16.mxu1 %v1041_v48 }
 0x113   :  { %1044 = vmatpush3.bf16.msra.mxu1 %v1041_v48 }
 0x114   :  { %1046 = vmatprep.subr.bf16.mxu1 %v1045_v51 }
 0x117   :  { %1048 = vmatpush3.bf16.msra.mxu1 %v1045_v51 }
 0x1cd   :  { %v864_v55 = vpop.f32.mrb[0].mxu1 }
 0x1ce   :  { %v201_v56 = vpop.f32.mrb[1].mxu1 }
 0x1cf   :  { %212 = vperm.xlu1 %1091, %v201_v56   ;;  %221 = vperm.xlu0 %1090, %v201_v56  }
 0x1d3   :  { %217 = vperm.xlu1 %1091, %v864_v55   ;;  %224 = vperm.xlu0 %1090, %v864_v55  }
 0x1d7   :  { %1092 = vset.pattern.permute.xlu1 %v1134_v53 }
 0x24e   :  { %v222_v61 = vpop.permute.xlu0 %221  ;;  %v213_v62 = vpop.permute.xlu1 %212 }
 0x24f   :  { %v231_v2 = vrot.slane %v222_v61, %v1277_v63  ;;  %v459_v61 = vld [vmem:[%s1426_s4 + $0x10] sm:$0xff] }
 0x252   :  { %v225_v1 = vpop.permute.xlu0 %224  ;;  %v218_v4 = vpop.permute.xlu1 %217 }
 0x253   :  { %v236_v3 = vrot.slane %v225_v1, %v1279_v0  ;;  %v460_v1 = vld [vmem:[%s1426_s4 + $0x18] sm:$0xff] }
 0x255   :  { %v238_v5 = vsel %vm237_vm0, %v236_v3, %v231_v2  ;;  %v1053_v2 = vpack.c.bf16 %v460_v1, %v459_v61  ;;  %v461_v3 = vld [vmem:[%s1426_s4 + $0x20] sm:$0xff] }
 0x256   :  { %v252_v6 = vadd.f32 %v238_v5, %v213_v62  ;;  %v253_v7 = vadd.f32 %v238_v5, %v218_v4  ;;  %v1049_v62 = vpack.c.bf16 %v458_v60, %v457_v59  ;;  %v462_v4 = vld [vmem:[%s1426_s4 + $0x28] sm:$0xff] }
 0x257   :  { %v1057_v5 = vpack.c.bf16 %v462_v4, %v461_v3 }
 0x258   :  { %vm255_vm1 = vcmp.gt.f32.partialorder %v253_v7, 0.0  ;;  %v257_v10 = vmul.f32 0.2, %v253_v7  ;;  %vm254_vm2 = vcmp.gt.f32.partialorder %v252_v6, 0.0  ;;  %v256_v11 = vmul.f32 0.2, %v252_v6  ;;  %1050 = vmatprep.subr.bf16.mxu0 %v1049_v62 }
 0x25a   :  { %v259_v12 = vsel %vm255_vm1, %v253_v7, %v257_v10  ;;  %v258_v13 = vsel %vm254_vm2, %v252_v6, %v256_v11  ;;  %v463_v6 = vld [vmem:[%s1426_s4 + $0x30] sm:$0xff]  ;;  %v464_v7 = vld [vmem:[%s1426_s4 + $0x38] sm:$0xff]  ;;  %v465_v11 = vld [vmem:[%s1426_s4 + $0x40] sm:$0xff] }
 0x25b   :  { %v261_v14 = vadd.f32 %v259_v12, %v1287_v8  ;;  %v260_v15 = vadd.f32 %v258_v13, %v1292_v9  ;;  %v1061_v10 = vpack.c.bf16 %v464_v7, %v463_v6  ;;  %v466_v12 = vld [vmem:[%s1426_s4 + $0x48] sm:$0xff] }
 0x25c   :  { %v1065_v13 = vpack.c.bf16 %v466_v12, %v465_v11 }
 0x25d   :  { %v266_v16 = vsel %vm262_vm3, %v261_v14, -inf  ;;  %v263_v17 = vsel %vm262_vm3, %v260_v15, -inf }
 0x25e   :  { %267 = vmax.xlane.f32.xlu1 %v266_v16  ;;  %264 = vmax.xlane.f32.xlu0 %v263_v17  ;;  %v469_v17 = vld [vmem:[%s1426_s4 + $0x60] sm:$0xff] }
 0x2eb   :  { %v268_v18 = vpop.xlane.xlu1 %267  ;;  %v265_v19 = vpop.xlane.xlu0 %264 }
 0x2ec   :  { %v270_v20 = vsub.f32 %v261_v14, %v268_v18  ;;  %v269_v21 = vsub.f32 %v260_v15, %v265_v19  ;;  %v467_v14 = vld [vmem:[%s1426_s4 + $0x50] sm:$0xff]  ;;  %v468_v15 = vld [vmem:[%s1426_s4 + $0x58] sm:$0xff]  ;;  %v470_v18 = vld [vmem:[%s1426_s4 + $0x68] sm:$0xff] }
 0x2ed   :  { %v1069_v16 = vpack.c.bf16 %v468_v15, %v467_v14  ;;  %v1073_v19 = vpack.c.bf16 %v470_v18, %v469_v17 }
 0x2ee   :  { %v271_v22 = vmul.f32 1.442695, %v269_v21  ;;  %v273_v23 = vmul.f32 1.442695, %v270_v20  ;;  %v471_v20 = vld [vmem:[%s1426_s4 + $0x70] sm:$0xff]  ;;  %v472_v21 = vld [vmem:[%s1426_s4 + $0x78] sm:$0xff] }
 0x2ef   :  { %s1136_s4 = smov [#allocation2]  }
 0x2f0   :  { %1094 = vpow2.f32 %v271_v22  ;;  %v1077_v22 = vpack.c.bf16 %v472_v21, %v471_v20  ;;  %s700_s23 = sshll.u32 %s1136_s4, 4  ;;  %s701_s23 = int_to_ptr.vmem [resolvable:$true] %s700_s23 }
 0x2f1   :  { %1096 = vpow2.f32 %v273_v23  ;;  %s1110_s24 = scalar_lea.vmem %s701_s23, 256  ;;  %p1115_p1 = scmp.lt.s32.totalorder %s701_s23, %s701_s23 }
 0x2f2   :  { %p1111_p0 = scmp.ne.s32.totalorder %s701_s23, %s1110_s24  ;;  %p1116_p2 = scmp.lt.s32.totalorder %s1110_s24, %s1110_s24 }
 0x2f4   :  { %p1117_p3 = por %p1116_p2, %p1115_p1 }
 0x2f6   :  { %p1118_p4 = pnand %p1117_p3, %p1111_p0 }
 0x2fa   :  { %v1095_v24 = vpop.eup %1094 }
 0x2fb   :  { %v275_v25 = vsel %vm262_vm3, %v1095_v24, 0.0  ;;  %v1097_v26 = vpop.eup %1096 }
 0x2fc   :  { %276 = vadd.xlane.f32.xlu0 %v275_v25  ;;  %v278_v27 = vsel %vm262_vm3, %v1097_v26, 0.0 }
 0x300   :  { %279 = vadd.xlane.f32.xlu0 %v278_v27 }
 0x389   :  { %v277_v52 = vpop.xlane.xlu0 %276 }
 0x38a   :  { %1098 = vrcp.f32 %v277_v52 }
 0x38d   :  { %v280_v53 = vpop.xlane.xlu0 %279 }
 0x38e   :  { %1100 = vrcp.f32 %v280_v53 }
 0x394   :  { %v1099_v55 = vpop.eup %1098 }
 0x395   :  { %v283_v56 = vmul.f32 %v1099_v55, %v1095_v24 }
 0x397   :  { %869 = vmatprep.mubr.msk.f32.mxu0 %vm262_vm3, %v283_v56 }
 0x398   :  { %v1101_v57 = vpop.eup %1100 }
 0x399   :  { %v284_v58 = vmul.f32 %v1101_v57, %v1097_v26 }
 0x39b   :  { %870 = vmatmul.mubr.msk.f32.vlgmr.msra.gmra.mrb[2].mxu0 %vm262_vm3, %v284_v58 }
 0x39c   :  { %1052 = vmatpush3.bf16.msra.mxu0 %v1049_v62 }
 0x39d   :  { %1054 = vmatprep.subr.bf16.mxu0 %v1053_v2 }
 0x3a0   :  { %1056 = vmatpush3.bf16.msra.mxu0 %v1053_v2 }
 0x3a1   :  { %1058 = vmatprep.subr.bf16.mxu0 %v1057_v5 }
 0x3a4   :  { %1060 = vmatpush3.bf16.msra.mxu0 %v1057_v5 }
 0x3a5   :  { %1062 = vmatprep.subr.bf16.mxu0 %v1061_v10 }
 0x3a8   :  { %1064 = vmatpush3.bf16.msra.mxu0 %v1061_v10 }
 0x3a9   :  { %1066 = vmatprep.subr.bf16.mxu0 %v1065_v13 }
 0x3ac   :  { %1068 = vmatpush3.bf16.msra.mxu0 %v1065_v13 }
 0x3ad   :  { %1070 = vmatprep.subr.bf16.mxu0 %v1069_v16 }
 0x3b0   :  { %1072 = vmatpush3.bf16.msra.mxu0 %v1069_v16 }
 0x3b1   :  { %1074 = vmatprep.subr.bf16.mxu0 %v1073_v19 }
 0x3b4   :  { %1076 = vmatpush3.bf16.msra.mxu0 %v1073_v19 }
 0x3b5   :  { %1078 = vmatprep.subr.bf16.mxu0 %v1077_v22 }
 0x3b8   :  { %1080 = vmatpush3.bf16.msra.mxu0 %v1077_v22 }
 0x46e   :  { %v871_v23 = vpop.f32.mrb[2].mxu0 }
 0x46f   :  { %v357_v24 = vpop.f32.mrb[3].mxu0 }
 0x470   :  { %904 = vmatprep.mubr.f32.mxu1 %v357_v24 }
 0x471   :  { %905 = vmatmul.mubr.f32.vlgmr.msra.gmra.mrb[2].mxu1 %v871_v23 }
 0x544   :  { %v906_v25 = vpop.f32.mrb[2].mxu1 }
 0x545   :  { %v448_v26 = vpop.f32.mrb[3].mxu1 }
 0x546   :  { %v1081_v27 = vpack.c.bf16 %v906_v25, %v448_v26  ;;  %939 = vmatprep.mubr.f32.mxu0 %v448_v26 }
 0x547   :  { %940 = vmatmul.mubr.f32.vlgmr.msra.gmra.mrb[4].mxu0 %v906_v25 }
 0x548   :  { %1082 = vmatprep.subr.bf16.mxu1 %v1081_v27 }
 0x549   :  { %1084 = vmatpush3.bf16.msra.mxu1 %v1081_v27 }
 0x61a   :  { %v941_v28 = vpop.f32.mrb[4].mxu0 }
 0x61b   :  { %562 = vperm.xlu0 %1090, %v941_v28   ;;  %v539_v29 = vpop.f32.mrb[5].mxu0 }
 0x61c   :  { %559 = vperm.xlu1 %1092, %v539_v29  }
 0x620   :  { %1093 = vset.pattern.permute.xlu1 %v1135_v54 }
 0x621   :  { %550 = vperm.xlu1 %1093, %v539_v29  }
 0x625   :  { %555 = vperm.xlu1 %1093, %v941_v28  }
 0x69a   :  { %v563_v30 = vpop.permute.xlu0 %562 }
 0x69b   :  { %v560_v31 = vpop.permute.xlu1 %559  ;;  %v571_v32 = vrot.slane %v563_v30, %v1279_v0 }
 0x69c   :  { %v567_v33 = vrot.slane %v560_v31, %v1277_v63 }
 0x69e   :  { %v572_v34 = vsel %vm237_vm0, %v571_v32, %v567_v33 }
 0x6a0   :  { %v551_v35 = vpop.permute.xlu1 %550 }
 0x6a1   :  { %v580_v36 = vadd.f32 %v572_v34, %v551_v35 }
 0x6a3   :  { %vm582_vm4 = vcmp.gt.f32.partialorder %v580_v36, 0.0  ;;  %v584_v37 = vmul.f32 0.2, %v580_v36 }
 0x6a4   :  { %v556_v38 = vpop.permute.xlu1 %555 }
 0x6a5   :  { %v581_v39 = vadd.f32 %v572_v34, %v556_v38  ;;  %v586_v40 = vsel %vm582_vm4, %v580_v36, %v584_v37 }
 0x6a6   :  { %v588_v41 = vadd.f32 %v586_v40, %v1292_v9 }
 0x6a7   :  { %vm583_vm5 = vcmp.gt.f32.partialorder %v581_v39, 0.0  ;;  %v585_v54 = vmul.f32 0.2, %v581_v39 }
 0x6a8   :  { %v590_v42 = vsel %vm262_vm3, %v588_v41, -inf }
 0x6a9   :  { %591 = vmax.xlane.f32.xlu0 %v590_v42  ;;  %v587_v43 = vsel %vm583_vm5, %v581_v39, %v585_v54 }
 0x6aa   :  { %v589_v0 = vadd.f32 %v587_v43, %v1287_v8 }
 0x6ac   :  { %v593_v63 = vsel %vm262_vm3, %v589_v0, -inf }
 0x6ad   :  { %594 = vmax.xlane.f32.xlu1 %v593_v63 }
 0x736   :  { %v592_v44 = vpop.xlane.xlu0 %591 }
 0x737   :  { %v596_v45 = vsub.f32 %v588_v41, %v592_v44 }
 0x739   :  { %v598_v46 = vmul.f32 1.442695, %v596_v45 }
 0x73a   :  { %v595_v47 = vpop.xlane.xlu1 %594 }
 0x73b   :  { %1102 = vpow2.f32 %v598_v46  ;;  %v597_v48 = vsub.f32 %v589_v0, %v595_v47 }
 0x73d   :  { %v600_v49 = vmul.f32 1.442695, %v597_v48 }
 0x73f   :  { %1104 = vpow2.f32 %v600_v49 }
 0x745   :  { %v1103_v9 = vpop.eup %1102 }
 0x746   :  { %v602_v50 = vsel %vm262_vm3, %v1103_v9, 0.0 }
 0x747   :  { %603 = vadd.xlane.f32.xlu0 %v602_v50 }
 0x749   :  { %v1105_v51 = vpop.eup %1104 }
 0x74a   :  { %v605_v52 = vsel %vm262_vm3, %v1105_v51, 0.0 }
 0x74b   :  { %606 = vadd.xlane.f32.xlu0 %v605_v52 }
 0x7d4   :  { %v604_v8 = vpop.xlane.xlu0 %603 }
 0x7d5   :  { %1106 = vrcp.f32 %v604_v8 }
 0x7d8   :  { %v607_v53 = vpop.xlane.xlu0 %606 }
 0x7d9   :  { %1108 = vrcp.f32 %v607_v53 }
 0x7df   :  { %v1107_v55 = vpop.eup %1106 }
 0x7e0   :  { %v610_v56 = vmul.f32 %v1107_v55, %v1103_v9 }
 0x7e2   :  { %946 = vmatprep.mubr.msk.f32.mxu1 %vm262_vm3, %v610_v56 }
 0x7e3   :  { %v1109_v57 = vpop.eup %1108 }
 0x7e4   :  { %v611_v58 = vmul.f32 %v1109_v57, %v1105_v51 }
 0x7e6   :  { %947 = vmatmul.mubr.msk.f32.vlgmr.msra.gmra.mrb[4].mxu1 %vm262_vm3, %v611_v58 }
 0x8b9   :  { %v948_v59 = vpop.f32.mrb[4].mxu1 }
 0x8ba   :  { %694 = vst [vmem:[#allocation2 + $0x8] sm:$0xff] %v948_v59  ;;  %v684_v60 = vpop.f32.mrb[5].mxu1 }
 0x8bb   :  { %693 = vst [vmem:[#allocation2] sm:$0xff] %v684_v60 }
 0x8bc   :  { %1121 = shalt.err (!%p1118_p4)
}
 0x8bd   :  { %s1122_s27 = scalar_lea.hbm %s1428_s6, 256 }
 0x8be   :  { %p1123_p5 = scmp.ne.s32.totalorder %s1428_s6, %s1122_s27  ;;  %p1126_p6 = scmp.lt.u32.totalorder %s1122_s27, %s1428_s6 }
 0x8c0   :  { %p1128_p7 = pnand %p1126_p6, %p1123_p5 }
 0x8c2   :  { %1131 = shalt.err (!%p1128_p7)
}
 0x8c3   :  { %s1137_s8 = smov 128   ;;  %s1138_s9 = smov 8  }
 0x8c4   :  { %706 = dma.vmem_to_hbm [thread:$0]  %s701_s23, 256, %s1428_s6, [#allocation3], %s1137_s8, %s1137_s8, %s1138_s9  }
 0x8c5   :  { %1132 = dma.done.wait [#allocation3], 256  }
 0x8c6   :  { %1133 = vsyncadd [#allocation3], 4294967040 }
 0x8c7   :  { %710 = vsyncpa [#allocation3], 1 }

</bundles_post_ra>
